<compile_context>
chip_gen: v5e
topology: v5e:2x2
jax: 0.10.0
libtpu: 0.0.40
codegen_flags: <defaults>
</compile_context>

<pallas_src>
import functools

import jax
import jax.numpy as jnp
from jax import lax
from jax.experimental import pallas as pl
from jax.experimental.pallas import tpu as pltpu


def _round_up(x, m):
    return ((x + m - 1) // m) * m


def mlp_block_kernel(x_ref, w_ref, b_ref, o_ref, acc_ref):
    k = pl.program_id(2)

    @pl.when(k == 0)
    def _():
        # Fold the bias add into accumulator init: acc <- broadcast(bias).
        acc_ref[...] = jnp.zeros_like(acc_ref) + b_ref[...].astype(jnp.float32)

    # x tile (tm, tk) contracted with weight tile (tn, tk) along K — this is
    # x @ W^T on the MXU without ever materializing a transposed weight.
    acc_ref[...] += lax.dot_general(
        x_ref[...],
        w_ref[...],
        dimension_numbers=(((1,), (1,)), ((), ())),
        preferred_element_type=jnp.float32,
    )

    @pl.when(k == pl.num_programs(2) - 1)
    def _():
        # Dropout(p=0.0) / eval mode is identity; apply ReLU and store.
        # TODO(synk): training-mode dropout (p > 0) would need pltpu.prng_* masking.
        o_ref[...] = jnp.maximum(acc_ref[...], 0.0).astype(o_ref.dtype)


@functools.partial(jax.jit, static_argnames=("tile_m", "tile_n", "tile_k", "compute_dtype"))
def mlp_block(x, weight, bias, *, tile_m=256, tile_n=512, tile_k=512,
              compute_dtype=None):
    """MLPBlock forward: ReLU(x @ weight.T + bias), dropout p=0 (eval).

    x:      (M, K)
    weight: (N, K)   -- PyTorch Linear convention (out_features, in_features)
    bias:   (N,)
    returns (M, N) in x.dtype
    """
    M, K = x.shape
    N, K2 = weight.shape
    assert K == K2 and bias.shape == (N,)
    out_dtype = x.dtype

    # --- Lane-dense output: pad N up to a multiple of 128 (sliced off after).
    N_pad = max(_round_up(N, 128), 128)
    if N_pad != N:
        weight = jnp.pad(weight, ((0, N_pad - N), (0, 0)))
        bias = jnp.pad(bias, (0, N_pad - N))
    b2d = bias.reshape(1, N_pad).astype(jnp.float32)

    # --- K tiling: tk must be a multiple of 128 or equal K (lane dim of x / w
    # blocks). Zero-pad K when tiled so padded slabs contribute 0 to the dot.
    if K <= tile_k:
        tk, K_pad = K, K
    else:
        tk = _round_up(min(tile_k, K), 128)
        K_pad = _round_up(K, tk)
        if K_pad != K:
            x = jnp.pad(x, ((0, 0), (0, K_pad - K)))
            weight = jnp.pad(weight, ((0, 0), (0, K_pad - K)))

    # --- M / N tiles: multiples of 8 / 128, clamped to the (padded) problem.
    tm = min(_round_up(tile_m, 8), _round_up(M, 8))
    tn = min(_round_up(tile_n, 128), N_pad)

    # Optional reduced-precision MXU operands (accumulation stays f32).
    if compute_dtype is not None:
        x = x.astype(compute_dtype)
        weight = weight.astype(compute_dtype)

    grid = (pl.cdiv(M, tm), pl.cdiv(N_pad, tn), K_pad // tk)

    out = pl.pallas_call(
        mlp_block_kernel,
        out_shape=jax.ShapeDtypeStruct((M, N_pad), out_dtype),
        grid_spec=pltpu.PrefetchScalarGridSpec(
            num_scalar_prefetch=0,
            grid=grid,
            in_specs=[
                pl.BlockSpec((tm, tk), lambda i, j, k: (i, k)),   # x row/K tile
                pl.BlockSpec((tn, tk), lambda i, j, k: (j, k)),   # weight (N, K) tile
                pl.BlockSpec((1, tn), lambda i, j, k: (0, j)),    # bias tile
            ],
            out_specs=pl.BlockSpec((tm, tn), lambda i, j, k: (i, j)),
            scratch_shapes=[pltpu.VMEM((tm, tn), jnp.float32)],
        ),
        compiler_params=pltpu.CompilerParams(
            dimension_semantics=("parallel", "parallel", "arbitrary"),
        ),
    )(x, weight, b2d)

    if N_pad != N:
        out = out[:, :N]
    return out


if __name__ == "__main__":
    # Small shapes consistent with MLPBlock(input_size=32, output_size=64)
    batch, input_size, output_size = 8, 32, 64

    key = jax.random.PRNGKey(0)
    kx, kw, kb = jax.random.split(key, 3)

    x = jax.random.normal(kx, (batch, input_size), dtype=jnp.float32)
    # PyTorch-Linear-shaped parameters: weight (out, in), bias (out,)
    bound = 1.0 / jnp.sqrt(input_size)
    weight = jax.random.uniform(kw, (output_size, input_size),
                                minval=-bound, maxval=bound, dtype=jnp.float32)
    bias = jax.random.uniform(kb, (output_size,),
                              minval=-bound, maxval=bound, dtype=jnp.float32)

    out = mlp_block(x, weight, bias)
    out = jax.block_until_ready(out)

    # Reference check (same semantics as the PyTorch module in eval mode).
    ref = jnp.maximum(x @ weight.T + bias, 0.0)
    assert out.shape == (batch, output_size)
    assert jnp.allclose(out, ref, atol=1e-5, rtol=1e-5)

    print("KERNEL_OK")
</pallas_src>

<mosaic_0001>
module attributes {stable_mosaic.version = 11 : i64} {
  func.func @mlp_block_kernel(%arg0: i32, %arg1: i32, %arg2: i32, %arg3: memref<8x32xf32, #tpu.memory_space<vmem>>, %arg4: memref<128x32xf32, #tpu.memory_space<vmem>>, %arg5: memref<1x128xf32, #tpu.memory_space<vmem>>, %arg6: memref<8x128xf32, #tpu.memory_space<vmem>>, %arg7: memref<8x128xf32, #tpu.memory_space<vmem>>) attributes {dimension_semantics = [#tpu.dimension_semantics<parallel>, #tpu.dimension_semantics<parallel>, #tpu.dimension_semantics<arbitrary>], iteration_bounds = array<i64: 1, 1, 1>, scalar_prefetch = 0 : i64, scratch_operands = 1 : i64, tpu.core_type = #tpu.core_type<tc>, window_params = [{transform_indices = @transform_0, window_bounds = array<i64: 8, 32>}, {transform_indices = @transform_1, window_bounds = array<i64: 128, 32>}, {transform_indices = @transform_2, window_bounds = array<i64: 1, 128>}, {transform_indices = @transform_3, window_bounds = array<i64: 8, 128>}]} {
    %c0_i32 = arith.constant 0 : i32
    %0 = arith.cmpi eq, %arg2, %c0_i32 : i32
    %1 = arith.extui %0 : i1 to i32
    %c0_i32_0 = arith.constant 0 : i32
    %2 = arith.cmpi ne, %1, %c0_i32_0 : i32
    scf.if %2 {
      %cst_10 = arith.constant 0.000000e+00 : f32
      %12 = vector.broadcast %cst_10 : f32 to vector<8x128xf32>
      %c0_11 = arith.constant 0 : index
      %c0_12 = arith.constant 0 : index
      %13 = vector.load %arg5[%c0_11, %c0_12] : memref<1x128xf32, #tpu.memory_space<vmem>>, vector<1x128xf32>
      %14 = vector.broadcast %13 : vector<1x128xf32> to vector<8x128xf32>
      %15 = arith.addf %12, %14 : vector<8x128xf32>
      %c0_13 = arith.constant 0 : index
      %c0_14 = arith.constant 0 : index
      %16 = vector.load %arg7[%c0_13, %c0_14] : memref<8x128xf32, #tpu.memory_space<vmem>>, vector<8x128xf32>
      tpu.vector_store %arg7[%c0_13, %c0_14], %15 {strides = array<i32>} : memref<8x128xf32, #tpu.memory_space<vmem>>, vector<8x128xf32>,
    } else {
    }
    %c0 = arith.constant 0 : index
    %c0_1 = arith.constant 0 : index
    %3 = vector.load %arg7[%c0, %c0_1] : memref<8x128xf32, #tpu.memory_space<vmem>>, vector<8x128xf32>
    %c0_2 = arith.constant 0 : index
    %c0_3 = arith.constant 0 : index
    %4 = vector.load %arg3[%c0_2, %c0_3] : memref<8x32xf32, #tpu.memory_space<vmem>>, vector<8x32xf32>
    %c0_4 = arith.constant 0 : index
    %c0_5 = arith.constant 0 : index
    %5 = vector.load %arg4[%c0_4, %c0_5] : memref<128x32xf32, #tpu.memory_space<vmem>>, vector<128x32xf32>
    %cst = arith.constant dense<0.000000e+00> : vector<8x128xf32>
    %6 = tpu.matmul %4, %5, %cst {dimension_numbers = #tpu.dot_dimension_numbers<[1], [1], [0], [0], [0, 0, 1, 0], [], []>} : vector<8x32xf32>, vector<128x32xf32>, vector<8x128xf32> -> vector<8x128xf32>
    %7 = arith.addf %3, %6 : vector<8x128xf32>
    %c0_6 = arith.constant 0 : index
    %c0_7 = arith.constant 0 : index
    %8 = vector.load %arg7[%c0_6, %c0_7] : memref<8x128xf32, #tpu.memory_space<vmem>>, vector<8x128xf32>
    tpu.vector_store %arg7[%c0_6, %c0_7], %7 {strides = array<i32>} : memref<8x128xf32, #tpu.memory_space<vmem>>, vector<8x128xf32>,
    %c0_i32_8 = arith.constant 0 : i32
    %9 = arith.cmpi eq, %arg2, %c0_i32_8 : i32
    %10 = arith.extui %9 : i1 to i32
    %c0_i32_9 = arith.constant 0 : i32
    %11 = arith.cmpi ne, %10, %c0_i32_9 : i32
    scf.if %11 {
      %c0_10 = arith.constant 0 : index
      %c0_11 = arith.constant 0 : index
      %12 = vector.load %arg7[%c0_10, %c0_11] : memref<8x128xf32, #tpu.memory_space<vmem>>, vector<8x128xf32>
      %cst_12 = arith.constant 0.000000e+00 : f32
      %13 = vector.broadcast %cst_12 : f32 to vector<8x128xf32>
      %14 = arith.maximumf %12, %13 : vector<8x128xf32>
      %c0_13 = arith.constant 0 : index
      %c0_14 = arith.constant 0 : index
      %15 = vector.load %arg6[%c0_13, %c0_14] : memref<8x128xf32, #tpu.memory_space<vmem>>, vector<8x128xf32>
      tpu.vector_store %arg6[%c0_13, %c0_14], %14 {strides = array<i32>} : memref<8x128xf32, #tpu.memory_space<vmem>>, vector<8x128xf32>,
    } else {
    }
    return
  }
  func.func @transform_0(%arg0: i32, %arg1: i32, %arg2: i32) -> (i32, i32) {
    %c0_i32 = arith.constant 0 : i32
    return %arg0, %arg2 : i32, i32
  }
  func.func @transform_1(%arg0: i32, %arg1: i32, %arg2: i32) -> (i32, i32) {
    %c0_i32 = arith.constant 0 : i32
    return %arg1, %arg2 : i32, i32
  }
  func.func @transform_2(%arg0: i32, %arg1: i32, %arg2: i32) -> (i32, i32) {
    %c0_i32 = arith.constant 0 : i32
    %c0_i32_0 = arith.constant 0 : i32
    return %c0_i32, %arg1 : i32, i32
  }
  func.func @transform_3(%arg0: i32, %arg1: i32, %arg2: i32) -> (i32, i32) {
    %c0_i32 = arith.constant 0 : i32
    return %arg0, %arg1 : i32, i32
  }
}

</mosaic_0001>

<bundles_post_ra>
// kernel: mlp_block.1
= control target key start
LH: loop header
LB: loop body
LE: loop exit
PB: predicated region body
PF: predicated region fallthrough
CT: control target
= control target key end

     0   :  { %vm43_vm0 = vcmask 261120   ;;  %s279_s0 = inlined_call_operand.vmem [shape: f32[8,32], index: 0, kind: input, shape index: {}]   ;;  %s280_s1 = inlined_call_operand.vmem [shape: f32[128,32], index: 1, kind: input, shape index: {}]   ;;  %s281_s2 = inlined_call_operand.vmem [shape: f32[1,128], index: 2, kind: input, shape index: {}]   ;;  %s282_s3 = inlined_call_operand.hbm [shape: f32[8,128], index: 3, kind: output, shape index: {}]  }
   0x1   :  { %v42_v0 = vld [vmem:[%s280_s1 + $0x78] sm:$0xff]  ;;  %v41_v1 = vld [vmem:[%s280_s1 + $0x70] sm:$0xff] }
   0x2   :  { %139 = vmatpush.xpose.msk.msra.mxu0 %vm43_vm0, %v42_v0 }
   0x3   :  { %8 = vsyncpa [#allocation4], 0  ;;  %v40_v2 = vld [vmem:[%s280_s1 + $0x68] sm:$0xff]  ;;  %v39_v3 = vld [vmem:[%s280_s1 + $0x60] sm:$0xff]  ;;  %s184_s21 = smov [#allocation3]   ;;  %s130_s25 = sshll.u32 %s282_s3, 4  ;;  %s131_s25 = int_to_ptr.hbm [resolvable:$true] %s130_s25 }
   0x4   :  { %v38_v4 = vld [vmem:[%s280_s1 + $0x58] sm:$0xff]  ;;  %v37_v5 = vld [vmem:[%s280_s1 + $0x50] sm:$0xff]  ;;  %v36_v6 = vld [vmem:[%s280_s1 + $0x48] sm:$0xff]  ;;  %s128_s22 = sshll.u32 %s184_s21, 4  ;;  %s129_s22 = int_to_ptr.vmem [resolvable:$true] %s128_s22 }
   0x5   :  { %v35_v7 = vld [vmem:[%s280_s1 + $0x40] sm:$0xff]  ;;  %v34_v8 = vld [vmem:[%s280_s1 + $0x38] sm:$0xff]  ;;  %v33_v9 = vld [vmem:[%s280_s1 + $0x30] sm:$0xff] }
   0x6   :  { %140 = vmatpush.xpose.msk.msra.mxu0 %vm43_vm0, %v41_v1  ;;  %v32_v10 = vld [vmem:[%s280_s1 + $0x28] sm:$0xff]  ;;  %v31_v11 = vld [vmem:[%s280_s1 + $0x20] sm:$0xff]  ;;  %v30_v12 = vld [vmem:[%s280_s1 + $0x18] sm:$0xff] }
   0x7   :  { %v29_v13 = vld [vmem:[%s280_s1 + $0x10] sm:$0xff]  ;;  %v28_v14 = vld [vmem:[%s280_s1 + $0x8] sm:$0xff]  ;;  %v27_v15 = vld [vmem:[%s280_s1] sm:$0xff] }
   0x8   :  { %v26_v16 = vld [vmem:[%s279_s0] sm:$0xff] }
   0x9   :  { %v157_v17 = vld [vmem:[%s281_s2] ss:$0 sm:$0xff] }
   0xa   :  { %141 = vmatpush.xpose.msk.msra.mxu0 %vm43_vm0, %v40_v2 }
   0xe   :  { %142 = vmatpush.xpose.msk.msra.mxu0 %vm43_vm0, %v39_v3 }
  0x12   :  { %143 = vmatpush.xpose.msk.msra.mxu0 %vm43_vm0, %v38_v4 }
  0x16   :  { %144 = vmatpush.xpose.msk.msra.mxu0 %vm43_vm0, %v37_v5 }
  0x1a   :  { %145 = vmatpush.xpose.msk.msra.mxu0 %vm43_vm0, %v36_v6 }
  0x1e   :  { %146 = vmatpush.xpose.msk.msra.mxu0 %vm43_vm0, %v35_v7 }
  0x22   :  { %147 = vmatpush.xpose.msk.msra.mxu0 %vm43_vm0, %v34_v8 }
  0x26   :  { %148 = vmatpush.xpose.msk.msra.mxu0 %vm43_vm0, %v33_v9 }
  0x2a   :  { %149 = vmatpush.xpose.msk.msra.mxu0 %vm43_vm0, %v32_v10 }
  0x2e   :  { %150 = vmatpush.xpose.msk.msra.mxu0 %vm43_vm0, %v31_v11 }
  0x32   :  { %151 = vmatpush.xpose.msk.msra.mxu0 %vm43_vm0, %v30_v12 }
  0x36   :  { %152 = vmatpush.xpose.msk.msra.mxu0 %vm43_vm0, %v29_v13 }
  0x3a   :  { %153 = vmatpush.xpose.msk.msra.mxu0 %vm43_vm0, %v28_v14 }
  0x3e   :  { %154 = vmatpush.xpose.msk.msra.mxu0 %vm43_vm0, %v27_v15 }
  0x41   :  { %155 = vmatmul.msk.f32.vlgmr.msra.gmra.mxu0 %vm43_vm0, %v26_v16 }
  0xbe   :  { %v112_v18 = vpop.f32.mrf.mxu0 }
  0xbf   :  { %v115_v19 = vadd.f32 %v157_v17, %v112_v18 }
  0xc1   :  { %v121_v20 = vmax.f32 %v115_v19, 0.0 }
  0xc3   :  { %122 = vst [vmem:[#allocation3] sm:$0xff] %v121_v20 }
  0xc4   :  { %133 = dma.vmem_to_hbm [thread:$0]  %s129_s22, 128, %s131_s25, [#allocation4]  }
  0xc5   :  { %182 = dma.done.wait [#allocation4], 128  }
  0xc6   :  { %183 = vsyncadd [#allocation4], 4294967168 }
  0xc7   :  { %138 = vsyncpa [#allocation4], 1 }

</bundles_post_ra>
